<compile_context>
chip_gen: v7x
topology: tpu7x:2x2x1
jax: 0.10.0
libtpu: 0.0.40
codegen_flags: <defaults>
</compile_context>

<pallas_src>
import jax
import jax.numpy as jnp
from jax import lax
from jax.experimental import pallas as pl
from jax.experimental.pallas import tpu as pltpu  # noqa: F401  (TPU backend)
import numpy as np


# ------------------------------------------------------------------ kernel ---
def lstm_encoder_kernel(xproj_ref, mask_ref, whh_ref, enc_ref, lasth_ref, lastc_ref):
    """Whole-sequence LSTM recurrence in one invocation (everything VMEM resident).

    xproj_ref : (T, B, 4H) f32  precomputed  emb[tok] @ W_ih^T + (b_ih + b_hh)
    mask_ref  : (B, T)     f32  1.0 where t < src_len[b] else 0.0 (lane-dense control data)
    whh_ref   : (H, 4H)    f32  W_hh^T
    enc_ref   : (B, T*H)   f32  batch-first, lane-dense per-step hidden states
    lasth_ref : (B, H)     f32  final hidden state (at each sequence's true last step)
    lastc_ref : (B, H)     f32  final cell state
    """
    T, B, _ = xproj_ref.shape
    H = whh_ref.shape[0]

    whh = whh_ref[...]                         # (H, 4H), resident across all steps
    valid = mask_ref[...] > 0.5                # (B, T) bool, computed once

    h = jnp.zeros((B, H), jnp.float32)
    c = jnp.zeros((B, H), jnp.float32)

    # Group enc writes so each store is at least 128 lanes wide (unmasked vst).
    group = 128 // H if (H < 128 and 128 % H == 0) else 1
    pending = []
    group_start = 0

    # T is small & static -> full unroll; serial path is only h @ W_hh^T + x_proj[t].
    for t in range(T):
        gates = xproj_ref[t] + jnp.dot(h, whh,
                                       preferred_element_type=jnp.float32)   # (B, 4H); i,f,g,o
        # Two full-width EUP passes instead of four quarter-vreg ones (H < 128).
        sig = jax.nn.sigmoid(gates)
        tnh = jnp.tanh(gates)
        i_g = sig[:, 0:H]
        f_g = sig[:, H:2 * H]
        g_g = tnh[:, 2 * H:3 * H]
        o_g = sig[:, 3 * H:4 * H]

        c_new = f_g * c + i_g * g_g
        h_new = o_g * jnp.tanh(c_new)

        m = valid[:, t:t + 1]                  # (B, 1) bool
        h = jnp.where(m, h_new, h)             # frozen past each sequence's length
        c = jnp.where(m, c_new, c)

        pending.append(jnp.where(m, h_new, 0.0))   # pad_packed_sequence zeros padded slots
        if len(pending) == group or t == T - 1:
            slab = pending[0] if len(pending) == 1 else jnp.concatenate(pending, axis=1)
            enc_ref[:, group_start * H:(t + 1) * H] = slab   # lane-dense store
            pending = []
            group_start = t + 1

    lasth_ref[...] = h
    lastc_ref[...] = c


# ----------------------------------------------------------------- wrapper ---
def encoder_forward(src_tokens, src_len, params):
    """src_tokens: (T, B) int32 padded tokens, src_len: (B,) int32 (descending)."""
    T, B = src_tokens.shape
    emb = params["embedding"].astype(jnp.float32)                  # (V, E)
    W_ih = params["w_ih"].astype(jnp.float32)                      # (4H, E)
    W_hh = params["w_hh"].astype(jnp.float32)                      # (4H, H)
    H = W_hh.shape[1]

    # Fold embedding lookup, input projection and bias:
    #   x_t @ W_ih^T + b  ==  (E @ W_ih^T + b)[tok_t]   (exact: one row per token).
    bias = (params["b_ih"] + params["b_hh"]).astype(jnp.float32)
    emb_proj = emb @ W_ih.T + bias[None, :]                        # (V, 4H), tiny
    whh_t = W_hh.T                                                 # (H, 4H)

    tok = src_tokens.astype(jnp.int32)
    x_proj = jnp.take(emb_proj, tok.reshape(-1), axis=0).reshape(T, B, 4 * H)   # XLA gather

    src_len = src_len.astype(jnp.int32)
    mask = (jnp.arange(T, dtype=jnp.int32)[None, :] < src_len[:, None]
            ).astype(jnp.float32)                                  # (B, T), lane-dense

    enc_flat, last_h, last_c = pl.pallas_call(
        lstm_encoder_kernel,
        out_shape=(
            jax.ShapeDtypeStruct((B, T * H), jnp.float32),         # lane-dense, batch-first
            jax.ShapeDtypeStruct((B, H), jnp.float32),
            jax.ShapeDtypeStruct((B, H), jnp.float32),
        ),
    )(x_proj, mask, whh_t)

    enc_hiddens = enc_flat.reshape(B, T, H)                        # free row-major reshape
    # last_h / last_c == torch.cat(tuple(h_n), 1) for the unidirectional single-layer case.
    return enc_hiddens, (last_h, last_c)


# --------------------------------------------------------- pure-JAX reference
def encoder_forward_ref(src_tokens, src_len, params):
    T, B = src_tokens.shape
    emb = params["embedding"]
    W_ih, W_hh = params["w_ih"], params["w_hh"]
    H = W_hh.shape[1]
    b = params["b_ih"] + params["b_hh"]
    x_emb = jnp.take(emb, src_tokens, axis=0).astype(jnp.float32)

    def step(carry, inp):
        h, c = carry
        x_t, t = inp
        gates = x_t @ W_ih.T + h @ W_hh.T + b
        i = jax.nn.sigmoid(gates[:, :H])
        f = jax.nn.sigmoid(gates[:, H:2 * H])
        g = jnp.tanh(gates[:, 2 * H:3 * H])
        o = jax.nn.sigmoid(gates[:, 3 * H:])
        c_new = f * c + i * g
        h_new = o * jnp.tanh(c_new)
        valid = (t < src_len)[:, None]
        h_u = jnp.where(valid, h_new, h)
        c_u = jnp.where(valid, c_new, c)
        return (h_u, c_u), jnp.where(valid, h_new, 0.0)

    init = (jnp.zeros((B, H), jnp.float32), jnp.zeros((B, H), jnp.float32))
    (h, c), ys = lax.scan(step, init, (x_emb, jnp.arange(T)))
    return jnp.transpose(ys, (1, 0, 2)), (h, c)


# -------------------------------------------------------------------- main ---
if __name__ == "__main__":
    # module hyper-parameters (small, TPU-friendly)
    VOCAB, E, H = 50, 16, 32           # input_size, embed_size, hidden_size
    T, B = 8, 8                        # max_seq_length, batch
    PAD = 0                            # padToken
    # TODO(synk): bidirectional=True branch not implemented (module default is False).

    key = jax.random.PRNGKey(0)
    k_emb, k_wih, k_whh, k_bih, k_bhh, k_tok = jax.random.split(key, 6)
    scale = 1.0 / np.sqrt(H)
    params = {
        "embedding": jax.random.normal(k_emb, (VOCAB, E), jnp.float32)
                        .at[PAD].set(0.0),                               # padding_idx row = 0
        "w_ih": jax.random.uniform(k_wih, (4 * H, E), jnp.float32, -scale, scale),
        "w_hh": jax.random.uniform(k_whh, (4 * H, H), jnp.float32, -scale, scale),
        "b_ih": jax.random.uniform(k_bih, (4 * H,), jnp.float32, -scale, scale),
        "b_hh": jax.random.uniform(k_bhh, (4 * H,), jnp.float32, -scale, scale),
    }

    # lengths sorted descending (enforce_sorted=True), longest == T
    src_len = jnp.array([8, 7, 6, 5, 4, 3, 2, 1], dtype=jnp.int32)
    tokens = jax.random.randint(k_tok, (T, B), 1, VOCAB, dtype=jnp.int32)
    # zero out (pad) positions beyond each sequence's length
    t_idx = jnp.arange(T)[:, None]
    src_tokens = jnp.where(t_idx < src_len[None, :], tokens, PAD)

    enc, (last_h, last_c) = jax.jit(encoder_forward)(src_tokens, src_len, params)
    jax.block_until_ready((enc, last_h, last_c))

    enc_r, (h_r, c_r) = jax.jit(encoder_forward_ref)(src_tokens, src_len, params)
    np.testing.assert_allclose(np.asarray(enc), np.asarray(enc_r), atol=1e-4, rtol=1e-4)
    np.testing.assert_allclose(np.asarray(last_h), np.asarray(h_r), atol=1e-4, rtol=1e-4)
    np.testing.assert_allclose(np.asarray(last_c), np.asarray(c_r), atol=1e-4, rtol=1e-4)

    assert enc.shape == (B, T, H) and last_h.shape == (B, H) and last_c.shape == (B, H)
    print("KERNEL_OK")
</pallas_src>

<mosaic_0001>
module attributes {stable_mosaic.version = 11 : i64} {
  func.func @lstm_encoder_kernel(%arg0: memref<8x8x128xf32, #tpu.memory_space<vmem>>, %arg1: memref<8x8xf32, #tpu.memory_space<vmem>>, %arg2: memref<32x128xf32, #tpu.memory_space<vmem>>, %arg3: memref<8x256xf32, #tpu.memory_space<vmem>>, %arg4: memref<8x32xf32, #tpu.memory_space<vmem>>, %arg5: memref<8x32xf32, #tpu.memory_space<vmem>>) attributes {dimension_semantics = [], scalar_prefetch = 0 : i64, scratch_operands = 0 : i64, tpu.core_type = #tpu.core_type<tc>} {
    %c0 = arith.constant 0 : index
    %c0_0 = arith.constant 0 : index
    %0 = vector.load %arg2[%c0, %c0_0] : memref<32x128xf32, #tpu.memory_space<vmem>>, vector<32x128xf32>
    %c0_1 = arith.constant 0 : index
    %c0_2 = arith.constant 0 : index
    %1 = vector.load %arg1[%c0_1, %c0_2] : memref<8x8xf32, #tpu.memory_space<vmem>>, vector<8x8xf32>
    %cst = arith.constant 5.000000e-01 : f32
    %2 = vector.broadcast %cst : f32 to vector<8x8xf32>
    %3 = arith.cmpf ogt, %1, %2 : vector<8x8xf32>
    %cst_3 = arith.constant 0.000000e+00 : f32
    %4 = vector.broadcast %cst_3 : f32 to vector<8x32xf32>
    %cst_4 = arith.constant 0.000000e+00 : f32
    %5 = vector.broadcast %cst_4 : f32 to vector<8x32xf32>
    %c0_5 = arith.constant 0 : index
    %c0_6 = arith.constant 0 : index
    %c0_7 = arith.constant 0 : index
    %6 = vector.load %arg0[%c0_5, %c0_6, %c0_7] : memref<8x8x128xf32, #tpu.memory_space<vmem>>, vector<1x8x128xf32>
    %7 = vector.shape_cast %6 : vector<1x8x128xf32> to vector<8x128xf32>
    %cst_8 = arith.constant dense<0.000000e+00> : vector<8x128xf32>
    %8 = tpu.matmul %4, %0, %cst_8 {dimension_numbers = #tpu.dot_dimension_numbers<[1], [0], [0], [1], [0, 0, 1, 1], [], []>} : vector<8x32xf32>, vector<32x128xf32>, vector<8x128xf32> -> vector<8x128xf32>
    %9 = arith.addf %7, %8 : vector<8x128xf32>
    %10 = arith.negf %9 : vector<8x128xf32>
    %11 = math.exp %10 : vector<8x128xf32>
    %cst_9 = arith.constant 1.000000e+00 : f32
    %12 = vector.broadcast %cst_9 : f32 to vector<8x128xf32>
    %13 = arith.addf %12, %11 : vector<8x128xf32>
    %14 = arith.divf %12, %13 : vector<8x128xf32>
    %15 = math.tanh %9 : vector<8x128xf32>
    %16 = vector.extract_strided_slice %14 {offsets = [0, 0], sizes = [8, 32], strides = [1, 1]} : vector<8x128xf32> to vector<8x32xf32>
    %17 = vector.extract_strided_slice %14 {offsets = [0, 32], sizes = [8, 32], strides = [1, 1]} : vector<8x128xf32> to vector<8x32xf32>
    %18 = vector.extract_strided_slice %15 {offsets = [0, 64], sizes = [8, 32], strides = [1, 1]} : vector<8x128xf32> to vector<8x32xf32>
    %19 = vector.extract_strided_slice %14 {offsets = [0, 96], sizes = [8, 32], strides = [1, 1]} : vector<8x128xf32> to vector<8x32xf32>
    %20 = arith.mulf %17, %5 : vector<8x32xf32>
    %21 = arith.mulf %16, %18 : vector<8x32xf32>
    %22 = arith.addf %20, %21 : vector<8x32xf32>
    %23 = math.tanh %22 : vector<8x32xf32>
    %24 = arith.mulf %19, %23 : vector<8x32xf32>
    %25 = vector.extract_strided_slice %3 {offsets = [0, 0], sizes = [8, 1], strides = [1, 1]} : vector<8x8xi1> to vector<8x1xi1>
    %26 = vector.shape_cast %25 : vector<8x1xi1> to vector<8x1xi1>
    %27 = vector.broadcast %26 : vector<8x1xi1> to vector<8x32xi1>
    %28 = arith.select %27, %24, %4 : vector<8x32xi1>, vector<8x32xf32>
    %29 = vector.shape_cast %25 : vector<8x1xi1> to vector<8x1xi1>
    %30 = vector.broadcast %29 : vector<8x1xi1> to vector<8x32xi1>
    %31 = arith.select %30, %22, %5 : vector<8x32xi1>, vector<8x32xf32>
    %cst_10 = arith.constant 0.000000e+00 : f32
    %32 = vector.shape_cast %25 : vector<8x1xi1> to vector<8x1xi1>
    %33 = vector.broadcast %32 : vector<8x1xi1> to vector<8x32xi1>
    %34 = vector.broadcast %cst_10 : f32 to vector<8x32xf32>
    %35 = arith.select %33, %24, %34 : vector<8x32xi1>, vector<8x32xf32>
    %c1 = arith.constant 1 : index
    %c0_11 = arith.constant 0 : index
    %c0_12 = arith.constant 0 : index
    %36 = vector.load %arg0[%c1, %c0_11, %c0_12] : memref<8x8x128xf32, #tpu.memory_space<vmem>>, vector<1x8x128xf32>
    %37 = vector.shape_cast %36 : vector<1x8x128xf32> to vector<8x128xf32>
    %cst_13 = arith.constant dense<0.000000e+00> : vector<8x128xf32>
    %38 = tpu.matmul %28, %0, %cst_13 {dimension_numbers = #tpu.dot_dimension_numbers<[1], [0], [0], [1], [0, 0, 1, 1], [], []>} : vector<8x32xf32>, vector<32x128xf32>, vector<8x128xf32> -> vector<8x128xf32>
    %39 = arith.addf %37, %38 : vector<8x128xf32>
    %40 = arith.negf %39 : vector<8x128xf32>
    %41 = math.exp %40 : vector<8x128xf32>
    %cst_14 = arith.constant 1.000000e+00 : f32
    %42 = vector.broadcast %cst_14 : f32 to vector<8x128xf32>
    %43 = arith.addf %42, %41 : vector<8x128xf32>
    %44 = arith.divf %42, %43 : vector<8x128xf32>
    %45 = math.tanh %39 : vector<8x128xf32>
    %46 = vector.extract_strided_slice %44 {offsets = [0, 0], sizes = [8, 32], strides = [1, 1]} : vector<8x128xf32> to vector<8x32xf32>
    %47 = vector.extract_strided_slice %44 {offsets = [0, 32], sizes = [8, 32], strides = [1, 1]} : vector<8x128xf32> to vector<8x32xf32>
    %48 = vector.extract_strided_slice %45 {offsets = [0, 64], sizes = [8, 32], strides = [1, 1]} : vector<8x128xf32> to vector<8x32xf32>
    %49 = vector.extract_strided_slice %44 {offsets = [0, 96], sizes = [8, 32], strides = [1, 1]} : vector<8x128xf32> to vector<8x32xf32>
    %50 = arith.mulf %47, %31 : vector<8x32xf32>
    %51 = arith.mulf %46, %48 : vector<8x32xf32>
    %52 = arith.addf %50, %51 : vector<8x32xf32>
    %53 = math.tanh %52 : vector<8x32xf32>
    %54 = arith.mulf %49, %53 : vector<8x32xf32>
    %55 = vector.extract_strided_slice %3 {offsets = [0, 1], sizes = [8, 1], strides = [1, 1]} : vector<8x8xi1> to vector<8x1xi1>
    %56 = vector.shape_cast %55 : vector<8x1xi1> to vector<8x1xi1>
    %57 = vector.broadcast %56 : vector<8x1xi1> to vector<8x32xi1>
    %58 = arith.select %57, %54, %28 : vector<8x32xi1>, vector<8x32xf32>
    %59 = vector.shape_cast %55 : vector<8x1xi1> to vector<8x1xi1>
    %60 = vector.broadcast %59 : vector<8x1xi1> to vector<8x32xi1>
    %61 = arith.select %60, %52, %31 : vector<8x32xi1>, vector<8x32xf32>
    %cst_15 = arith.constant 0.000000e+00 : f32
    %62 = vector.shape_cast %55 : vector<8x1xi1> to vector<8x1xi1>
    %63 = vector.broadcast %62 : vector<8x1xi1> to vector<8x32xi1>
    %64 = vector.broadcast %cst_15 : f32 to vector<8x32xf32>
    %65 = arith.select %63, %54, %64 : vector<8x32xi1>, vector<8x32xf32>
    %c2 = arith.constant 2 : index
    %c0_16 = arith.constant 0 : index
    %c0_17 = arith.constant 0 : index
    %66 = vector.load %arg0[%c2, %c0_16, %c0_17] : memref<8x8x128xf32, #tpu.memory_space<vmem>>, vector<1x8x128xf32>
    %67 = vector.shape_cast %66 : vector<1x8x128xf32> to vector<8x128xf32>
    %cst_18 = arith.constant dense<0.000000e+00> : vector<8x128xf32>
    %68 = tpu.matmul %58, %0, %cst_18 {dimension_numbers = #tpu.dot_dimension_numbers<[1], [0], [0], [1], [0, 0, 1, 1], [], []>} : vector<8x32xf32>, vector<32x128xf32>, vector<8x128xf32> -> vector<8x128xf32>
    %69 = arith.addf %67, %68 : vector<8x128xf32>
    %70 = arith.negf %69 : vector<8x128xf32>
    %71 = math.exp %70 : vector<8x128xf32>
    %cst_19 = arith.constant 1.000000e+00 : f32
    %72 = vector.broadcast %cst_19 : f32 to vector<8x128xf32>
    %73 = arith.addf %72, %71 : vector<8x128xf32>
    %74 = arith.divf %72, %73 : vector<8x128xf32>
    %75 = math.tanh %69 : vector<8x128xf32>
    %76 = vector.extract_strided_slice %74 {offsets = [0, 0], sizes = [8, 32], strides = [1, 1]} : vector<8x128xf32> to vector<8x32xf32>
    %77 = vector.extract_strided_slice %74 {offsets = [0, 32], sizes = [8, 32], strides = [1, 1]} : vector<8x128xf32> to vector<8x32xf32>
    %78 = vector.extract_strided_slice %75 {offsets = [0, 64], sizes = [8, 32], strides = [1, 1]} : vector<8x128xf32> to vector<8x32xf32>
    %79 = vector.extract_strided_slice %74 {offsets = [0, 96], sizes = [8, 32], strides = [1, 1]} : vector<8x128xf32> to vector<8x32xf32>
    %80 = arith.mulf %77, %61 : vector<8x32xf32>
    %81 = arith.mulf %76, %78 : vector<8x32xf32>
    %82 = arith.addf %80, %81 : vector<8x32xf32>
    %83 = math.tanh %82 : vector<8x32xf32>
    %84 = arith.mulf %79, %83 : vector<8x32xf32>
    %85 = vector.extract_strided_slice %3 {offsets = [0, 2], sizes = [8, 1], strides = [1, 1]} : vector<8x8xi1> to vector<8x1xi1>
    %86 = vector.shape_cast %85 : vector<8x1xi1> to vector<8x1xi1>
    %87 = vector.broadcast %86 : vector<8x1xi1> to vector<8x32xi1>
    %88 = arith.select %87, %84, %58 : vector<8x32xi1>, vector<8x32xf32>
    %89 = vector.shape_cast %85 : vector<8x1xi1> to vector<8x1xi1>
    %90 = vector.broadcast %89 : vector<8x1xi1> to vector<8x32xi1>
    %91 = arith.select %90, %82, %61 : vector<8x32xi1>, vector<8x32xf32>
    %cst_20 = arith.constant 0.000000e+00 : f32
    %92 = vector.shape_cast %85 : vector<8x1xi1> to vector<8x1xi1>
    %93 = vector.broadcast %92 : vector<8x1xi1> to vector<8x32xi1>
    %94 = vector.broadcast %cst_20 : f32 to vector<8x32xf32>
    %95 = arith.select %93, %84, %94 : vector<8x32xi1>, vector<8x32xf32>
    %c3 = arith.constant 3 : index
    %c0_21 = arith.constant 0 : index
    %c0_22 = arith.constant 0 : index
    %96 = vector.load %arg0[%c3, %c0_21, %c0_22] : memref<8x8x128xf32, #tpu.memory_space<vmem>>, vector<1x8x128xf32>
    %97 = vector.shape_cast %96 : vector<1x8x128xf32> to vector<8x128xf32>
    %cst_23 = arith.constant dense<0.000000e+00> : vector<8x128xf32>
    %98 = tpu.matmul %88, %0, %cst_23 {dimension_numbers = #tpu.dot_dimension_numbers<[1], [0], [0], [1], [0, 0, 1, 1], [], []>} : vector<8x32xf32>, vector<32x128xf32>, vector<8x128xf32> -> vector<8x128xf32>
    %99 = arith.addf %97, %98 : vector<8x128xf32>
    %100 = arith.negf %99 : vector<8x128xf32>
    %101 = math.exp %100 : vector<8x128xf32>
    %cst_24 = arith.constant 1.000000e+00 : f32
    %102 = vector.broadcast %cst_24 : f32 to vector<8x128xf32>
    %103 = arith.addf %102, %101 : vector<8x128xf32>
    %104 = arith.divf %102, %103 : vector<8x128xf32>
    %105 = math.tanh %99 : vector<8x128xf32>
    %106 = vector.extract_strided_slice %104 {offsets = [0, 0], sizes = [8, 32], strides = [1, 1]} : vector<8x128xf32> to vector<8x32xf32>
    %107 = vector.extract_strided_slice %104 {offsets = [0, 32], sizes = [8, 32], strides = [1, 1]} : vector<8x128xf32> to vector<8x32xf32>
    %108 = vector.extract_strided_slice %105 {offsets = [0, 64], sizes = [8, 32], strides = [1, 1]} : vector<8x128xf32> to vector<8x32xf32>
    %109 = vector.extract_strided_slice %104 {offsets = [0, 96], sizes = [8, 32], strides = [1, 1]} : vector<8x128xf32> to vector<8x32xf32>
    %110 = arith.mulf %107, %91 : vector<8x32xf32>
    %111 = arith.mulf %106, %108 : vector<8x32xf32>
    %112 = arith.addf %110, %111 : vector<8x32xf32>
    %113 = math.tanh %112 : vector<8x32xf32>
    %114 = arith.mulf %109, %113 : vector<8x32xf32>
    %115 = vector.extract_strided_slice %3 {offsets = [0, 3], sizes = [8, 1], strides = [1, 1]} : vector<8x8xi1> to vector<8x1xi1>
    %116 = vector.shape_cast %115 : vector<8x1xi1> to vector<8x1xi1>
    %117 = vector.broadcast %116 : vector<8x1xi1> to vector<8x32xi1>
    %118 = arith.select %117, %114, %88 : vector<8x32xi1>, vector<8x32xf32>
    %119 = vector.shape_cast %115 : vector<8x1xi1> to vector<8x1xi1>
    %120 = vector.broadcast %119 : vector<8x1xi1> to vector<8x32xi1>
    %121 = arith.select %120, %112, %91 : vector<8x32xi1>, vector<8x32xf32>
    %cst_25 = arith.constant 0.000000e+00 : f32
    %122 = vector.shape_cast %115 : vector<8x1xi1> to vector<8x1xi1>
    %123 = vector.broadcast %122 : vector<8x1xi1> to vector<8x32xi1>
    %124 = vector.broadcast %cst_25 : f32 to vector<8x32xf32>
    %125 = arith.select %123, %114, %124 : vector<8x32xi1>, vector<8x32xf32>
    %126 = tpu.concatenate %35, %65, %95, %125 in 1 : vector<8x32xf32>, vector<8x32xf32>, vector<8x32xf32>, vector<8x32xf32> -> vector<8x128xf32>
    %c0_26 = arith.constant 0 : index
    %c0_27 = arith.constant 0 : index
    %127 = vector.load %arg3[%c0_26, %c0_27] : memref<8x256xf32, #tpu.memory_space<vmem>>, vector<8x128xf32>
    tpu.vector_store %arg3[%c0_26, %c0_27], %126 {strides = array<i32>} : memref<8x256xf32, #tpu.memory_space<vmem>>, vector<8x128xf32>,
    %c4 = arith.constant 4 : index
    %c0_28 = arith.constant 0 : index
    %c0_29 = arith.constant 0 : index
    %128 = vector.load %arg0[%c4, %c0_28, %c0_29] : memref<8x8x128xf32, #tpu.memory_space<vmem>>, vector<1x8x128xf32>
    %129 = vector.shape_cast %128 : vector<1x8x128xf32> to vector<8x128xf32>
    %cst_30 = arith.constant dense<0.000000e+00> : vector<8x128xf32>
    %130 = tpu.matmul %118, %0, %cst_30 {dimension_numbers = #tpu.dot_dimension_numbers<[1], [0], [0], [1], [0, 0, 1, 1], [], []>} : vector<8x32xf32>, vector<32x128xf32>, vector<8x128xf32> -> vector<8x128xf32>
    %131 = arith.addf %129, %130 : vector<8x128xf32>
    %132 = arith.negf %131 : vector<8x128xf32>
    %133 = math.exp %132 : vector<8x128xf32>
    %cst_31 = arith.constant 1.000000e+00 : f32
    %134 = vector.broadcast %cst_31 : f32 to vector<8x128xf32>
    %135 = arith.addf %134, %133 : vector<8x128xf32>
    %136 = arith.divf %134, %135 : vector<8x128xf32>
    %137 = math.tanh %131 : vector<8x128xf32>
    %138 = vector.extract_strided_slice %136 {offsets = [0, 0], sizes = [8, 32], strides = [1, 1]} : vector<8x128xf32> to vector<8x32xf32>
    %139 = vector.extract_strided_slice %136 {offsets = [0, 32], sizes = [8, 32], strides = [1, 1]} : vector<8x128xf32> to vector<8x32xf32>
    %140 = vector.extract_strided_slice %137 {offsets = [0, 64], sizes = [8, 32], strides = [1, 1]} : vector<8x128xf32> to vector<8x32xf32>
    %141 = vector.extract_strided_slice %136 {offsets = [0, 96], sizes = [8, 32], strides = [1, 1]} : vector<8x128xf32> to vector<8x32xf32>
    %142 = arith.mulf %139, %121 : vector<8x32xf32>
    %143 = arith.mulf %138, %140 : vector<8x32xf32>
    %144 = arith.addf %142, %143 : vector<8x32xf32>
    %145 = math.tanh %144 : vector<8x32xf32>
    %146 = arith.mulf %141, %145 : vector<8x32xf32>
    %147 = vector.extract_strided_slice %3 {offsets = [0, 4], sizes = [8, 1], strides = [1, 1]} : vector<8x8xi1> to vector<8x1xi1>
    %148 = vector.shape_cast %147 : vector<8x1xi1> to vector<8x1xi1>
    %149 = vector.broadcast %148 : vector<8x1xi1> to vector<8x32xi1>
    %150 = arith.select %149, %146, %118 : vector<8x32xi1>, vector<8x32xf32>
    %151 = vector.shape_cast %147 : vector<8x1xi1> to vector<8x1xi1>
    %152 = vector.broadcast %151 : vector<8x1xi1> to vector<8x32xi1>
    %153 = arith.select %152, %144, %121 : vector<8x32xi1>, vector<8x32xf32>
    %cst_32 = arith.constant 0.000000e+00 : f32
    %154 = vector.shape_cast %147 : vector<8x1xi1> to vector<8x1xi1>
    %155 = vector.broadcast %154 : vector<8x1xi1> to vector<8x32xi1>
    %156 = vector.broadcast %cst_32 : f32 to vector<8x32xf32>
    %157 = arith.select %155, %146, %156 : vector<8x32xi1>, vector<8x32xf32>
    %c5 = arith.constant 5 : index
    %c0_33 = arith.constant 0 : index
    %c0_34 = arith.constant 0 : index
    %158 = vector.load %arg0[%c5, %c0_33, %c0_34] : memref<8x8x128xf32, #tpu.memory_space<vmem>>, vector<1x8x128xf32>
    %159 = vector.shape_cast %158 : vector<1x8x128xf32> to vector<8x128xf32>
    %cst_35 = arith.constant dense<0.000000e+00> : vector<8x128xf32>
    %160 = tpu.matmul %150, %0, %cst_35 {dimension_numbers = #tpu.dot_dimension_numbers<[1], [0], [0], [1], [0, 0, 1, 1], [], []>} : vector<8x32xf32>, vector<32x128xf32>, vector<8x128xf32> -> vector<8x128xf32>
    %161 = arith.addf %159, %160 : vector<8x128xf32>
    %162 = arith.negf %161 : vector<8x128xf32>
    %163 = math.exp %162 : vector<8x128xf32>
    %cst_36 = arith.constant 1.000000e+00 : f32
    %164 = vector.broadcast %cst_36 : f32 to vector<8x128xf32>
    %165 = arith.addf %164, %163 : vector<8x128xf32>
    %166 = arith.divf %164, %165 : vector<8x128xf32>
    %167 = math.tanh %161 : vector<8x128xf32>
    %168 = vector.extract_strided_slice %166 {offsets = [0, 0], sizes = [8, 32], strides = [1, 1]} : vector<8x128xf32> to vector<8x32xf32>
    %169 = vector.extract_strided_slice %166 {offsets = [0, 32], sizes = [8, 32], strides = [1, 1]} : vector<8x128xf32> to vector<8x32xf32>
    %170 = vector.extract_strided_slice %167 {offsets = [0, 64], sizes = [8, 32], strides = [1, 1]} : vector<8x128xf32> to vector<8x32xf32>
    %171 = vector.extract_strided_slice %166 {offsets = [0, 96], sizes = [8, 32], strides = [1, 1]} : vector<8x128xf32> to vector<8x32xf32>
    %172 = arith.mulf %169, %153 : vector<8x32xf32>
    %173 = arith.mulf %168, %170 : vector<8x32xf32>
    %174 = arith.addf %172, %173 : vector<8x32xf32>
    %175 = math.tanh %174 : vector<8x32xf32>
    %176 = arith.mulf %171, %175 : vector<8x32xf32>
    %177 = vector.extract_strided_slice %3 {offsets = [0, 5], sizes = [8, 1], strides = [1, 1]} : vector<8x8xi1> to vector<8x1xi1>
    %178 = vector.shape_cast %177 : vector<8x1xi1> to vector<8x1xi1>
    %179 = vector.broadcast %178 : vector<8x1xi1> to vector<8x32xi1>
    %180 = arith.select %179, %176, %150 : vector<8x32xi1>, vector<8x32xf32>
    %181 = vector.shape_cast %177 : vector<8x1xi1> to vector<8x1xi1>
    %182 = vector.broadcast %181 : vector<8x1xi1> to vector<8x32xi1>
    %183 = arith.select %182, %174, %153 : vector<8x32xi1>, vector<8x32xf32>
    %cst_37 = arith.constant 0.000000e+00 : f32
    %184 = vector.shape_cast %177 : vector<8x1xi1> to vector<8x1xi1>
    %185 = vector.broadcast %184 : vector<8x1xi1> to vector<8x32xi1>
    %186 = vector.broadcast %cst_37 : f32 to vector<8x32xf32>
    %187 = arith.select %185, %176, %186 : vector<8x32xi1>, vector<8x32xf32>
    %c6 = arith.constant 6 : index
    %c0_38 = arith.constant 0 : index
    %c0_39 = arith.constant 0 : index
    %188 = vector.load %arg0[%c6, %c0_38, %c0_39] : memref<8x8x128xf32, #tpu.memory_space<vmem>>, vector<1x8x128xf32>
    %189 = vector.shape_cast %188 : vector<1x8x128xf32> to vector<8x128xf32>
    %cst_40 = arith.constant dense<0.000000e+00> : vector<8x128xf32>
    %190 = tpu.matmul %180, %0, %cst_40 {dimension_numbers = #tpu.dot_dimension_numbers<[1], [0], [0], [1], [0, 0, 1, 1], [], []>} : vector<8x32xf32>, vector<32x128xf32>, vector<8x128xf32> -> vector<8x128xf32>
    %191 = arith.addf %189, %190 : vector<8x128xf32>
    %192 = arith.negf %191 : vector<8x128xf32>
    %193 = math.exp %192 : vector<8x128xf32>
    %cst_41 = arith.constant 1.000000e+00 : f32
    %194 = vector.broadcast %cst_41 : f32 to vector<8x128xf32>
    %195 = arith.addf %194, %193 : vector<8x128xf32>
    %196 = arith.divf %194, %195 : vector<8x128xf32>
    %197 = math.tanh %191 : vector<8x128xf32>
    %198 = vector.extract_strided_slice %196 {offsets = [0, 0], sizes = [8, 32], strides = [1, 1]} : vector<8x128xf32> to vector<8x32xf32>
    %199 = vector.extract_strided_slice %196 {offsets = [0, 32], sizes = [8, 32], strides = [1, 1]} : vector<8x128xf32> to vector<8x32xf32>
    %200 = vector.extract_strided_slice %197 {offsets = [0, 64], sizes = [8, 32], strides = [1, 1]} : vector<8x128xf32> to vector<8x32xf32>
    %201 = vector.extract_strided_slice %196 {offsets = [0, 96], sizes = [8, 32], strides = [1, 1]} : vector<8x128xf32> to vector<8x32xf32>
    %202 = arith.mulf %199, %183 : vector<8x32xf32>
    %203 = arith.mulf %198, %200 : vector<8x32xf32>
    %204 = arith.addf %202, %203 : vector<8x32xf32>
    %205 = math.tanh %204 : vector<8x32xf32>
    %206 = arith.mulf %201, %205 : vector<8x32xf32>
    %207 = vector.extract_strided_slice %3 {offsets = [0, 6], sizes = [8, 1], strides = [1, 1]} : vector<8x8xi1> to vector<8x1xi1>
    %208 = vector.shape_cast %207 : vector<8x1xi1> to vector<8x1xi1>
    %209 = vector.broadcast %208 : vector<8x1xi1> to vector<8x32xi1>
    %210 = arith.select %209, %206, %180 : vector<8x32xi1>, vector<8x32xf32>
    %211 = vector.shape_cast %207 : vector<8x1xi1> to vector<8x1xi1>
    %212 = vector.broadcast %211 : vector<8x1xi1> to vector<8x32xi1>
    %213 = arith.select %212, %204, %183 : vector<8x32xi1>, vector<8x32xf32>
    %cst_42 = arith.constant 0.000000e+00 : f32
    %214 = vector.shape_cast %207 : vector<8x1xi1> to vector<8x1xi1>
    %215 = vector.broadcast %214 : vector<8x1xi1> to vector<8x32xi1>
    %216 = vector.broadcast %cst_42 : f32 to vector<8x32xf32>
    %217 = arith.select %215, %206, %216 : vector<8x32xi1>, vector<8x32xf32>
    %c7 = arith.constant 7 : index
    %c0_43 = arith.constant 0 : index
    %c0_44 = arith.constant 0 : index
    %218 = vector.load %arg0[%c7, %c0_43, %c0_44] : memref<8x8x128xf32, #tpu.memory_space<vmem>>, vector<1x8x128xf32>
    %219 = vector.shape_cast %218 : vector<1x8x128xf32> to vector<8x128xf32>
    %cst_45 = arith.constant dense<0.000000e+00> : vector<8x128xf32>
    %220 = tpu.matmul %210, %0, %cst_45 {dimension_numbers = #tpu.dot_dimension_numbers<[1], [0], [0], [1], [0, 0, 1, 1], [], []>} : vector<8x32xf32>, vector<32x128xf32>, vector<8x128xf32> -> vector<8x128xf32>
    %221 = arith.addf %219, %220 : vector<8x128xf32>
    %222 = arith.negf %221 : vector<8x128xf32>
    %223 = math.exp %222 : vector<8x128xf32>
    %cst_46 = arith.constant 1.000000e+00 : f32
    %224 = vector.broadcast %cst_46 : f32 to vector<8x128xf32>
    %225 = arith.addf %224, %223 : vector<8x128xf32>
    %226 = arith.divf %224, %225 : vector<8x128xf32>
    %227 = math.tanh %221 : vector<8x128xf32>
    %228 = vector.extract_strided_slice %226 {offsets = [0, 0], sizes = [8, 32], strides = [1, 1]} : vector<8x128xf32> to vector<8x32xf32>
    %229 = vector.extract_strided_slice %226 {offsets = [0, 32], sizes = [8, 32], strides = [1, 1]} : vector<8x128xf32> to vector<8x32xf32>
    %230 = vector.extract_strided_slice %227 {offsets = [0, 64], sizes = [8, 32], strides = [1, 1]} : vector<8x128xf32> to vector<8x32xf32>
    %231 = vector.extract_strided_slice %226 {offsets = [0, 96], sizes = [8, 32], strides = [1, 1]} : vector<8x128xf32> to vector<8x32xf32>
    %232 = arith.mulf %229, %213 : vector<8x32xf32>
    %233 = arith.mulf %228, %230 : vector<8x32xf32>
    %234 = arith.addf %232, %233 : vector<8x32xf32>
    %235 = math.tanh %234 : vector<8x32xf32>
    %236 = arith.mulf %231, %235 : vector<8x32xf32>
    %237 = vector.extract_strided_slice %3 {offsets = [0, 7], sizes = [8, 1], strides = [1, 1]} : vector<8x8xi1> to vector<8x1xi1>
    %238 = vector.shape_cast %237 : vector<8x1xi1> to vector<8x1xi1>
    %239 = vector.broadcast %238 : vector<8x1xi1> to vector<8x32xi1>
    %240 = arith.select %239, %236, %210 : vector<8x32xi1>, vector<8x32xf32>
    %241 = vector.shape_cast %237 : vector<8x1xi1> to vector<8x1xi1>
    %242 = vector.broadcast %241 : vector<8x1xi1> to vector<8x32xi1>
    %243 = arith.select %242, %234, %213 : vector<8x32xi1>, vector<8x32xf32>
    %cst_47 = arith.constant 0.000000e+00 : f32
    %244 = vector.shape_cast %237 : vector<8x1xi1> to vector<8x1xi1>
    %245 = vector.broadcast %244 : vector<8x1xi1> to vector<8x32xi1>
    %246 = vector.broadcast %cst_47 : f32 to vector<8x32xf32>
    %247 = arith.select %245, %236, %246 : vector<8x32xi1>, vector<8x32xf32>
    %248 = tpu.concatenate %157, %187, %217, %247 in 1 : vector<8x32xf32>, vector<8x32xf32>, vector<8x32xf32>, vector<8x32xf32> -> vector<8x128xf32>
    %c0_48 = arith.constant 0 : index
    %c128 = arith.constant 128 : index
    %249 = vector.load %arg3[%c0_48, %c128] : memref<8x256xf32, #tpu.memory_space<vmem>>, vector<8x128xf32>
    tpu.vector_store %arg3[%c0_48, %c128], %248 {strides = array<i32>} : memref<8x256xf32, #tpu.memory_space<vmem>>, vector<8x128xf32>,
    %c0_49 = arith.constant 0 : index
    %c0_50 = arith.constant 0 : index
    %250 = vector.load %arg4[%c0_49, %c0_50] : memref<8x32xf32, #tpu.memory_space<vmem>>, vector<8x32xf32>
    tpu.vector_store %arg4[%c0_49, %c0_50], %240 {strides = array<i32>} : memref<8x32xf32, #tpu.memory_space<vmem>>, vector<8x32xf32>,
    %c0_51 = arith.constant 0 : index
    %c0_52 = arith.constant 0 : index
    %251 = vector.load %arg5[%c0_51, %c0_52] : memref<8x32xf32, #tpu.memory_space<vmem>>, vector<8x32xf32>
    tpu.vector_store %arg5[%c0_51, %c0_52], %243 {strides = array<i32>} : memref<8x32xf32, #tpu.memory_space<vmem>>, vector<8x32xf32>,
    return
  }
}

</mosaic_0001>

<bundles_post_ra>
// kernel: encoder_forward.1
= control target key start
LH: loop header
LB: loop body
LE: loop exit
PB: predicated region body
PF: predicated region fallthrough
CT: control target
= control target key end

     0   :  { %11 = vsyncpa [#allocation3], 0  ;;  %v1302_v3 = vmov 0.0|0.0   ;;  %vm1303_vm0 = vmmov 0   ;;  %v1304_v6 = vmov 0.0   ;;  %s1605_s0 = inlined_call_operand.vmem [shape: f32[8,8,128], index: 0, kind: input, shape index: {}]   ;;  %s1606_s1 = inlined_call_operand.vmem [shape: f32[8,8], index: 1, kind: input, shape index: {}]   ;;  %s1607_s2 = inlined_call_operand.vmem [shape: f32[32,128], index: 2, kind: input, shape index: {}]   ;;  %s1608_s3 = inlined_call_operand.vmem [shape: f32[8,256], index: 3, kind: output, shape index: {0}]   ;;  %s1609_s4 = inlined_call_operand.hbm [shape: f32[8,32], index: 4, kind: output, shape index: {1}]   ;;  %s1610_s5 = inlined_call_operand.hbm [shape: f32[8,32], index: 5, kind: output, shape index: {2}]  }
   0x1   :  { %v19_v0 = vld [vmem:[%s1607_s2] sm:$0xff]  ;;  %v20_v1 = vld [vmem:[%s1607_s2 + $0x8] sm:$0xff]  ;;  %v21_v2 = vld [vmem:[%s1607_s2 + $0x10] sm:$0xff]  ;;  %1118 = vmatprep.subr.bf16.mxu0 %v1302_v3  ;;  %1038 = vmatprep.mubr.msk.f32.mxu0 %vm1303_vm0, %v1304_v6 }
   0x2   :  { %v1358_v4 = vpack.c.bf16 %v20_v1, %v19_v0  ;;  %v22_v5 = vld [vmem:[%s1607_s2 + $0x18] sm:$0xff] }
   0x3   :  { %12 = vsyncpa [#allocation5], 0  ;;  %1124 = vmatprep.subr.bf16.mxu1 %v1302_v3  ;;  %1049 = vmatprep.mubr.msk.f32.mxu1 %vm1303_vm0, %v1304_v6  ;;  %v1369_v7 = vpack.c.bf16 %v22_v5, %v21_v2  ;;  %v23_v8 = vld [vmem:[%s1606_s1] sm:$0xff]  ;;  %v1305_v9 = vmov 0   ;;  %s1306_s29 = smov 64   ;;  %s1307_s1 = smov 32  }
   0x4   :  { %1120 = vmatpush3.bf16.msra.mxu0 %v1358_v4  ;;  %1126 = vmatpush3.bf16.msra.mxu1 %v1358_v4  ;;  %vm24_vm1 = vcmp.gt.f32.partialorder %v23_v8, 0.5  ;;  %v25_v11 = vld [vmem:[%s1605_s0] sm:$0xff]  ;;  %vm26_vm3 = vcmask 261120   ;;  %v1308_v31 = vmov 1   ;;  %v969_v32 = vld [vmem:[%s1605_s0 + $0x8] sm:$0xff]  ;;  %v1309_v53 = vmov 2  }
   0x5   :  { %1121 = vmatprep.subr.bf16.mxu0 %v1302_v3  ;;  %1127 = vmatprep.subr.bf16.mxu1 %v1302_v3  ;;  %v1388_v10 = vsel %vm24_vm1, 1, %v1305_v9  ;;  %v972_v54 = vld [vmem:[%s1605_s0 + $0x10] sm:$0xff]  ;;  %vm469_vm11 = vcmask 523264   ;;  %vm471_vm12 = vcmask 785408   ;;  %s1316_s21 = smov [#allocation4]  }
   0x6   :  { %1182 = vset.pattern.permute.xlu1 %v1305_v9  ;;  %1184 = vset.pattern.permute.xlu0 %v1309_v53  ;;  %s954_s22 = sshll.u32 %s1316_s21, 4  ;;  %s955_s22 = int_to_ptr.vmem [resolvable:$true] %s954_s22 }
   0x7   :  { %127 = vperm.xlu1 %1182, %v1388_v10   ;;  %s1254_s25 = scalar_lea.vmem %s955_s22, 128  ;;  %p1259_p1 = scmp.lt.s32.totalorder %s955_s22, %s955_s22 }
   0x8   :  { %1123 = vmatpush3.bf16.msra.mxu0 %v1369_v7  ;;  %1129 = vmatpush3.bf16.msra.mxu1 %v1369_v7  ;;  %p1255_p0 = scmp.ne.s32.totalorder %s955_s22, %s1254_s25  ;;  %p1260_p2 = scmp.lt.s32.totalorder %s1254_s25, %s1254_s25 }
   0x9   :  { %1130 = vmatprep.subr.bf16.mxu0 %v1302_v3  ;;  %1136 = vmatprep.subr.bf16.mxu1 %v1302_v3 }
   0xa   :  { %p1261_p3 = por %p1260_p2, %p1259_p1 }
   0xb   :  { %1039 = vmatmul.mubr.f32.vlgmr.msra.gmra.mrb[0].mxu0 %v1304_v6  ;;  %1183 = vset.pattern.permute.xlu1 %v1308_v31 }
   0xc   :  { %1132 = vmatpush3.bf16.msra.mxu0 %v1358_v4  ;;  %1060 = vmatprep.mubr.msk.f32.mxu0 %vm1303_vm0, %v1304_v6  ;;  %p1262_p4 = pnand %p1261_p3, %p1255_p0 }
   0xd   :  { %1133 = vmatprep.subr.bf16.mxu0 %v1302_v3 }
  0x10   :  { %1135 = vmatpush3.bf16.msra.mxu0 %v1369_v7 }
  0x11   :  { %1142 = vmatprep.subr.bf16.mxu0 %v1302_v3 }
  0x86   :  { %v128_v26 = vpop.permute.xlu1 %127 }
  0x87   :  { %vm129_vm2 = vcmp.eq.s32.totalorder %v128_v26, 1 }
  0xde   :  { %v96_v12 = vpop.f32.mrb[0].mxu0 }
  0xdf   :  { %v100_v13 = vadd.f32 %v96_v12, %v25_v11  ;;  %v1040_v14 = vpop.f32.mrb[1].mxu0 }
  0xe1   :  { %1190 = vtanh.f32 %v100_v13  ;;  %v968_v16 = vmul.f32 -1.442695, %v100_v13 }
  0xe3   :  { %1192 = vpow2.f32 %v968_v16  ;;  %v1310_v16 = vmov 3  }
  0xeb   :  { %v1191_v15 = vpop.eup %1190 }
  0xec   :  { %110 = vrot.lane.b32.xlu0 %v1191_v15, %s1306_s29 }
  0xed   :  { %v1193_v17 = vpop.eup %1192 }
  0xee   :  { %v104_v18 = vadd.f32 1.0, %v1193_v17  ;;  %v975_v17 = vld [vmem:[%s1605_s0 + $0x18] sm:$0xff] }
  0xf0   :  { %1194 = vrcp.f32 %v104_v18 }
  0xfa   :  { %v1195_v19 = vpop.eup %1194 }
  0xfb   :  { %v108_v22 = vmul.f32 0.0, %v1195_v19 }
 0x15e   :  { %v111_v20 = vpop.permute.xlu0 %110 }
 0x15f   :  { %v113_v21 = vmul.f32 %v1195_v19, %v111_v20 }
 0x161   :  { %115 = vrot.lane.b32.xlu0 %v113_v21, %s1307_s1 }
 0x1d3   :  { %v116_v23 = vpop.permute.xlu0 %115 }
 0x1d4   :  { %v118_v24 = vadd.f32 %v116_v23, %v108_v22 }
 0x1d6   :  { %1196 = vtanh.f32 %v118_v24  ;;  %v131_v43 = vsel %vm129_vm2, %v118_v24, 0.0 }
 0x1e0   :  { %v1197_v25 = vpop.eup %1196 }
 0x1e1   :  { %121 = vrot.lane.b32.xlu1 %v1197_v25, %s1306_s29 }
 0x253   :  { %v122_v27 = vpop.permute.xlu1 %121 }
 0x254   :  { %v124_v28 = vmul.f32 %v1195_v19, %v122_v27 }
 0x256   :  { %v130_v29 = vsel %vm129_vm2, %v124_v28, 0.0 }
 0x257   :  { %135 = vrot.lane.b32.xlu0 %v130_v29, %s1307_s1 }
 0x2c9   :  { %v1399_v30 = vpop.permute.xlu0 %135 }
 0x2ca   :  { %1050 = vmatmul.mubr.msk.f32.vlgmr.msra.gmra.mrb[0].mxu1 %vm26_vm3, %v1399_v30 }
 0x2cb   :  { %1138 = vmatpush3.bf16.msra.mxu1 %v1358_v4  ;;  %1071 = vmatprep.mubr.msk.f32.mxu1 %vm1303_vm0, %v1304_v6 }
 0x2cc   :  { %1139 = vmatprep.subr.bf16.mxu1 %v1302_v3 }
 0x2cf   :  { %1141 = vmatpush3.bf16.msra.mxu1 %v1369_v7 }
 0x2d0   :  { %1148 = vmatprep.subr.bf16.mxu1 %v1302_v3 }
 0x39d   :  { %v205_v33 = vpop.f32.mrb[0].mxu1 }
 0x39e   :  { %v209_v34 = vadd.f32 %v969_v32, %v205_v33  ;;  %v1051_v35 = vpop.f32.mrb[1].mxu1 }
 0x3a0   :  { %1198 = vtanh.f32 %v209_v34  ;;  %v971_v37 = vmul.f32 -1.442695, %v209_v34 }
 0x3a2   :  { %1200 = vpow2.f32 %v971_v37 }
 0x3aa   :  { %v1199_v36 = vpop.eup %1198 }
 0x3ab   :  { %219 = vrot.lane.b32.xlu1 %v1199_v36, %s1306_s29 }
 0x3ac   :  { %v1201_v38 = vpop.eup %1200 }
 0x3ad   :  { %v213_v39 = vadd.f32 1.0, %v1201_v38 }
 0x3af   :  { %235 = vperm.xlu1 %1183, %v1388_v10   ;;  %1202 = vrcp.f32 %v213_v39  ;;  %v1311_v39 = vmov 4  }
 0x3b9   :  { %v1203_v40 = vpop.eup %1202 }
 0x3ba   :  { %v217_v44 = vmul.f32 %v1203_v40, %v131_v43 }
 0x41d   :  { %v220_v41 = vpop.permute.xlu1 %219 }
 0x41e   :  { %v222_v42 = vmul.f32 %v1203_v40, %v220_v41 }
 0x420   :  { %224 = vrot.lane.b32.xlu0 %v222_v42, %s1307_s1 }
 0x42e   :  { %v1417_v48 = vpop.permute.xlu1 %235 }
 0x42f   :  { %vm237_vm4 = vcmp.eq.s32.totalorder %v1417_v48, 1 }
 0x492   :  { %v225_v45 = vpop.permute.xlu0 %224 }
 0x493   :  { %v227_v46 = vadd.f32 %v225_v45, %v217_v44 }
 0x495   :  { %1204 = vtanh.f32 %v227_v46  ;;  %v239_v1 = vsel %vm237_vm4, %v227_v46, %v131_v43 }
 0x49f   :  { %v1205_v47 = vpop.eup %1204 }
 0x4a0   :  { %230 = vrot.lane.b32.xlu0 %v1205_v47, %s1306_s29 }
 0x512   :  { %v231_v49 = vpop.permute.xlu0 %230 }
 0x513   :  { %v1419_v50 = vmul.f32 %v1203_v40, %v231_v49  ;;  %v978_v40 = vld [vmem:[%s1605_s0 + $0x20] sm:$0xff] }
 0x515   :  { %v238_v51 = vsel %vm237_vm4, %v1419_v50, %v130_v29 }
 0x516   :  { %244 = vrot.lane.b32.xlu1 %v238_v51, %s1307_s1 }
 0x588   :  { %v245_v52 = vpop.permute.xlu1 %244 }
 0x589   :  { %1061 = vmatmul.mubr.msk.f32.vlgmr.msra.gmra.mrb[2].mxu0 %vm26_vm3, %v245_v52 }
 0x58a   :  { %1144 = vmatpush3.bf16.msra.mxu0 %v1358_v4  ;;  %1082 = vmatprep.mubr.msk.f32.mxu0 %vm1303_vm0, %v1304_v6 }
 0x58b   :  { %1145 = vmatprep.subr.bf16.mxu0 %v1302_v3 }
 0x58e   :  { %1147 = vmatpush3.bf16.msra.mxu0 %v1369_v7 }
 0x58f   :  { %1154 = vmatprep.subr.bf16.mxu0 %v1302_v3 }
 0x65c   :  { %v314_v55 = vpop.f32.mrb[2].mxu0 }
 0x65d   :  { %v318_v56 = vadd.f32 %v972_v54, %v314_v55  ;;  %v1062_v57 = vpop.f32.mrb[3].mxu0 }
 0x65f   :  { %1206 = vtanh.f32 %v318_v56  ;;  %v974_v59 = vmul.f32 -1.442695, %v318_v56 }
 0x661   :  { %1208 = vpow2.f32 %v974_v59 }
 0x669   :  { %v1207_v58 = vpop.eup %1206 }
 0x66a   :  { %328 = vrot.lane.b32.xlu0 %v1207_v58, %s1306_s29 }
 0x66b   :  { %v1209_v60 = vpop.eup %1208 }
 0x66c   :  { %v322_v61 = vadd.f32 1.0, %v1209_v60 }
 0x66e   :  { %344 = vperm.xlu0 %1184, %v1388_v10   ;;  %1210 = vrcp.f32 %v322_v61 }
 0x672   :  { %1185 = vset.pattern.permute.xlu0 %v1310_v16 }
 0x678   :  { %v1211_v62 = vpop.eup %1210 }
 0x679   :  { %v326_v2 = vmul.f32 %v1211_v62, %v239_v1 }
 0x6dc   :  { %v329_v63 = vpop.permute.xlu0 %328 }
 0x6dd   :  { %v331_v0 = vmul.f32 %v1211_v62, %v329_v63  ;;  %v1312_v63 = vmov 5  }
 0x6df   :  { %333 = vrot.lane.b32.xlu1 %v331_v0, %s1307_s1  ;;  %v981_v0 = vld [vmem:[%s1605_s0 + $0x28] sm:$0xff] }
 0x6ed   :  { %v1442_v11 = vpop.permute.xlu0 %344 }
 0x6ee   :  { %vm346_vm5 = vcmp.eq.s32.totalorder %v1442_v11, 1 }
 0x751   :  { %v334_v5 = vpop.permute.xlu1 %333 }
 0x752   :  { %v336_v8 = vadd.f32 %v334_v5, %v326_v2 }
 0x754   :  { %1212 = vtanh.f32 %v336_v8  ;;  %v348_v28 = vsel %vm346_vm5, %v336_v8, %v239_v1 }
 0x75e   :  { %v1213_v9 = vpop.eup %1212 }
 0x75f   :  { %339 = vrot.lane.b32.xlu1 %v1213_v9, %s1306_s29 }
 0x7d1   :  { %v340_v12 = vpop.permute.xlu1 %339 }
 0x7d2   :  { %v1444_v13 = vmul.f32 %v1211_v62, %v340_v12 }
 0x7d4   :  { %v347_v14 = vsel %vm346_vm5, %v1444_v13, %v238_v51 }
 0x7d5   :  { %353 = vrot.lane.b32.xlu1 %v347_v14, %s1307_s1 }
 0x847   :  { %v354_v15 = vpop.permute.xlu1 %353 }
 0x848   :  { %1072 = vmatmul.mubr.msk.f32.vlgmr.msra.gmra.mrb[2].mxu1 %vm26_vm3, %v354_v15 }
 0x849   :  { %1150 = vmatpush3.bf16.msra.mxu1 %v1358_v4  ;;  %1093 = vmatprep.mubr.msk.f32.mxu1 %vm1303_vm0, %v1304_v6 }
 0x84a   :  { %1151 = vmatprep.subr.bf16.mxu1 %v1302_v3 }
 0x84d   :  { %1153 = vmatpush3.bf16.msra.mxu1 %v1369_v7 }
 0x84e   :  { %1160 = vmatprep.subr.bf16.mxu1 %v1302_v3 }
 0x91b   :  { %v423_v18 = vpop.f32.mrb[2].mxu1 }
 0x91c   :  { %v427_v19 = vadd.f32 %v975_v17, %v423_v18  ;;  %v1073_v20 = vpop.f32.mrb[3].mxu1 }
 0x91e   :  { %1214 = vtanh.f32 %v427_v19  ;;  %v977_v22 = vmul.f32 -1.442695, %v427_v19 }
 0x920   :  { %1216 = vpow2.f32 %v977_v22 }
 0x928   :  { %v1215_v21 = vpop.eup %1214 }
 0x929   :  { %437 = vrot.lane.b32.xlu0 %v1215_v21, %s1306_s29 }
 0x92a   :  { %v1217_v23 = vpop.eup %1216 }
 0x92b   :  { %v431_v24 = vadd.f32 1.0, %v1217_v23 }
 0x92d   :  { %453 = vperm.xlu0 %1185, %v1388_v10   ;;  %1218 = vrcp.f32 %v431_v24  ;;  %v1313_v24 = vmov 6  }
 0x931   :  { %1186 = vset.pattern.permute.xlu0 %v1311_v39 }
 0x937   :  { %v1219_v25 = vpop.eup %1218 }
 0x938   :  { %v435_v29 = vmul.f32 %v1219_v25, %v348_v28 }
 0x99b   :  { %v438_v26 = vpop.permute.xlu0 %437 }
 0x99c   :  { %v440_v27 = vmul.f32 %v1219_v25, %v438_v26 }
 0x99e   :  { %442 = vrot.lane.b32.xlu1 %v440_v27, %s1307_s1 }
 0x9ac   :  { %v1467_v34 = vpop.permute.xlu0 %453 }
 0x9ad   :  { %vm455_vm6 = vcmp.eq.s32.totalorder %v1467_v34, 1 }
 0xa10   :  { %v443_v31 = vpop.permute.xlu1 %442 }
 0xa11   :  { %v445_v32 = vadd.f32 %v443_v31, %v435_v29 }
 0xa13   :  { %1220 = vtanh.f32 %v445_v32  ;;  %v457_v53 = vsel %vm455_vm6, %v445_v32, %v348_v28 }
 0xa1d   :  { %v1221_v33 = vpop.eup %1220 }
 0xa1e   :  { %448 = vrot.lane.b32.xlu1 %v1221_v33, %s1306_s29 }
 0xa90   :  { %v449_v35 = vpop.permute.xlu1 %448 }
 0xa91   :  { %v1469_v36 = vmul.f32 %v1219_v25, %v449_v35  ;;  %v984_v25 = vld [vmem:[%s1605_s0 + $0x30] sm:$0xff] }
 0xa93   :  { %v456_v37 = vsel %vm455_vm6, %v1469_v36, %v347_v14 }
 0xa94   :  { %477 = vrot.lane.b32.xlu1 %v456_v37, %s1307_s1 }
 0xb06   :  { %v478_v38 = vpop.permute.xlu1 %477 }
 0xb07   :  { %1083 = vmatmul.mubr.msk.f32.vlgmr.msra.gmra.mrb[4].mxu0 %vm26_vm3, %v478_v38 }
 0xb08   :  { %1156 = vmatpush3.bf16.msra.mxu0 %v1358_v4  ;;  %1104 = vmatprep.mubr.msk.f32.mxu0 %vm1303_vm0, %v1304_v6 }
 0xb09   :  { %1157 = vmatprep.subr.bf16.mxu0 %v1302_v3 }
 0xb0c   :  { %1159 = vmatpush3.bf16.msra.mxu0 %v1369_v7 }
 0xbda   :  { %v547_v41 = vpop.f32.mrb[4].mxu0 }
 0xbdb   :  { %v551_v42 = vadd.f32 %v978_v40, %v547_v41  ;;  %v1084_v43 = vpop.f32.mrb[5].mxu0 }
 0xbdd   :  { %1222 = vtanh.f32 %v551_v42  ;;  %v980_v45 = vmul.f32 -1.442695, %v551_v42 }
 0xbdf   :  { %1224 = vpow2.f32 %v980_v45 }
 0xbe7   :  { %v1223_v44 = vpop.eup %1222 }
 0xbe8   :  { %561 = vrot.lane.b32.xlu0 %v1223_v44, %s1306_s29 }
 0xbe9   :  { %v1225_v46 = vpop.eup %1224 }
 0xbea   :  { %v555_v47 = vadd.f32 1.0, %v1225_v46 }
 0xbec   :  { %577 = vperm.xlu0 %1186, %v1388_v10   ;;  %1226 = vrcp.f32 %v555_v47 }
 0xbf0   :  { %1187 = vset.pattern.permute.xlu0 %v1312_v63 }
 0xbf6   :  { %v1227_v49 = vpop.eup %1226 }
 0xbf7   :  { %v559_v54 = vmul.f32 %v1227_v49, %v457_v53 }
 0xc5a   :  { %v562_v51 = vpop.permute.xlu0 %561 }
 0xc5b   :  { %v564_v52 = vmul.f32 %v1227_v49, %v562_v51  ;;  %v1314_v51 = vmov 7  }
 0xc5d   :  { %566 = vrot.lane.b32.xlu1 %v564_v52, %s1307_s1  ;;  %v987_v52 = vld [vmem:[%s1605_s0 + $0x38] sm:$0xff]  ;;  %s1315_s0 = smov 96  }
 0xc6b   :  { %v1491_v58 = vpop.permute.xlu0 %577 }
 0xc6c   :  { %vm579_vm7 = vcmp.eq.s32.totalorder %v1491_v58, 1 }
 0xccf   :  { %v567_v55 = vpop.permute.xlu1 %566 }
 0xcd0   :  { %v569_v56 = vadd.f32 %v567_v55, %v559_v54 }
 0xcd2   :  { %1228 = vtanh.f32 %v569_v56  ;;  %v581_v14 = vsel %vm579_vm7, %v569_v56, %v457_v53 }
 0xcdc   :  { %v1229_v57 = vpop.eup %1228 }
 0xcdd   :  { %572 = vrot.lane.b32.xlu1 %v1229_v57, %s1306_s29 }
 0xd4f   :  { %v573_v59 = vpop.permute.xlu1 %572 }
 0xd50   :  { %v1493_v60 = vmul.f32 %v1227_v49, %v573_v59  ;;  %v349_v59 = vsel %vm346_vm5, %v1444_v13, 0.0  ;;  %v240_v13 = vsel %vm237_vm4, %v1419_v50, 0.0 }
 0xd52   :  { %v580_v61 = vsel %vm579_vm7, %v1493_v60, %v456_v37  ;;  %v582_v57 = vsel %vm579_vm7, %v1493_v60, 0.0 }
 0xd53   :  { %586 = vrot.lane.b32.xlu1 %v580_v61, %s1307_s1 }
 0xdc5   :  { %v587_v62 = vpop.permute.xlu1 %586 }
 0xdc6   :  { %1094 = vmatmul.mubr.msk.f32.vlgmr.msra.gmra.mrb[4].mxu1 %vm26_vm3, %v587_v62 }
 0xdc7   :  { %1162 = vmatpush3.bf16.msra.mxu1 %v1358_v4  ;;  %1115 = vmatprep.mubr.msk.f32.mxu1 %vm1303_vm0, %v1304_v6 }
 0xdc8   :  { %1163 = vmatprep.subr.bf16.mxu1 %v1302_v3 }
 0xdcb   :  { %1165 = vmatpush3.bf16.msra.mxu1 %v1369_v7 }
 0xe99   :  { %v656_v1 = vpop.f32.mrb[4].mxu1 }
 0xe9a   :  { %v660_v2 = vadd.f32 %v981_v0, %v656_v1  ;;  %v1095_v5 = vpop.f32.mrb[5].mxu1 }
 0xe9c   :  { %1230 = vtanh.f32 %v660_v2  ;;  %v983_v4 = vmul.f32 -1.442695, %v660_v2 }
 0xe9e   :  { %1232 = vpow2.f32 %v983_v4 }
 0xea6   :  { %v1231_v8 = vpop.eup %1230 }
 0xea7   :  { %670 = vrot.lane.b32.xlu0 %v1231_v8, %s1306_s29 }
 0xea8   :  { %v1233_v3 = vpop.eup %1232 }
 0xea9   :  { %v664_v6 = vadd.f32 1.0, %v1233_v3 }
 0xeab   :  { %686 = vperm.xlu0 %1187, %v1388_v10   ;;  %1234 = vrcp.f32 %v664_v6 }
 0xeaf   :  { %1188 = vset.pattern.permute.xlu0 %v1313_v24 }
 0xeb5   :  { %v1235_v7 = vpop.eup %1234 }
 0xeb6   :  { %v668_v15 = vmul.f32 %v1235_v7, %v581_v14 }
 0xf19   :  { %v671_v9 = vpop.permute.xlu0 %670 }
 0xf1a   :  { %v673_v12 = vmul.f32 %v1235_v7, %v671_v9 }
 0xf1c   :  { %675 = vrot.lane.b32.xlu1 %v673_v12, %s1307_s1 }
 0xf2a   :  { %v1515_v19 = vpop.permute.xlu0 %686 }
 0xf2b   :  { %vm688_vm8 = vcmp.eq.s32.totalorder %v1515_v19, 1 }
 0xf8e   :  { %v676_v16 = vpop.permute.xlu1 %675 }
 0xf8f   :  { %v678_v17 = vadd.f32 %v676_v16, %v668_v15  ;;  %v458_v16 = vsel %vm455_vm6, %v1469_v36, 0.0 }
 0xf91   :  { %1236 = vtanh.f32 %v678_v17  ;;  %v690_v39 = vsel %vm688_vm8, %v678_v17, %v581_v14 }
 0xf9b   :  { %v1237_v18 = vpop.eup %1236 }
 0xf9c   :  { %681 = vrot.lane.b32.xlu1 %v1237_v18, %s1306_s29 }
0x100e   :  { %v682_v20 = vpop.permute.xlu1 %681 }
0x100f   :  { %v1517_v21 = vmul.f32 %v1235_v7, %v682_v20 }
0x1011   :  { %v689_v22 = vsel %vm688_vm8, %v1517_v21, %v580_v61  ;;  %v691_v8 = vsel %vm688_vm8, %v1517_v21, 0.0 }
0x1012   :  { %695 = vrot.lane.b32.xlu1 %v689_v22, %s1307_s1 }
0x1084   :  { %v696_v23 = vpop.permute.xlu1 %695 }
0x1085   :  { %1105 = vmatmul.mubr.msk.f32.vlgmr.msra.gmra.mrb[6].mxu0 %vm26_vm3, %v696_v23 }
0x1158   :  { %v765_v26 = vpop.f32.mrb[6].mxu0 }
0x1159   :  { %v769_v27 = vadd.f32 %v984_v25, %v765_v26  ;;  %v1106_v28 = vpop.f32.mrb[7].mxu0 }
0x115b   :  { %1238 = vtanh.f32 %v769_v27  ;;  %v986_v31 = vmul.f32 -1.442695, %v769_v27 }
0x115d   :  { %1240 = vpow2.f32 %v986_v31 }
0x1165   :  { %v1239_v29 = vpop.eup %1238 }
0x1166   :  { %779 = vrot.lane.b32.xlu0 %v1239_v29, %s1306_s29 }
0x1167   :  { %v1241_v32 = vpop.eup %1240 }
0x1168   :  { %v773_v33 = vadd.f32 1.0, %v1241_v32 }
0x116a   :  { %795 = vperm.xlu0 %1188, %v1388_v10   ;;  %1242 = vrcp.f32 %v773_v33 }
0x116e   :  { %1189 = vset.pattern.permute.xlu0 %v1314_v51 }
0x1174   :  { %v1243_v35 = vpop.eup %1242 }
0x1175   :  { %v777_v40 = vmul.f32 %v1243_v35, %v690_v39 }
0x11d8   :  { %v780_v37 = vpop.permute.xlu0 %779 }
0x11d9   :  { %v782_v38 = vmul.f32 %v1243_v35, %v780_v37 }
0x11db   :  { %784 = vrot.lane.b32.xlu1 %v782_v38, %s1307_s1 }
0x11e9   :  { %v796_v44 = vpop.permute.xlu0 %795 }
0x11ea   :  { %vm797_vm9 = vcmp.eq.s32.totalorder %v796_v44, 1 }
0x124d   :  { %v785_v41 = vpop.permute.xlu1 %784 }
0x124e   :  { %v787_v42 = vadd.f32 %v785_v41, %v777_v40 }
0x1250   :  { %1244 = vtanh.f32 %v787_v42  ;;  %v799_v58 = vsel %vm797_vm9, %v787_v42, %v690_v39 }
0x125a   :  { %v1245_v43 = vpop.eup %1244 }
0x125b   :  { %790 = vrot.lane.b32.xlu1 %v1245_v43, %s1306_s29 }
0x12cd   :  { %v791_v45 = vpop.permute.xlu1 %790 }
0x12ce   :  { %v793_v46 = vmul.f32 %v1243_v35, %v791_v45 }
0x12d0   :  { %v798_v47 = vsel %vm797_vm9, %v793_v46, %v689_v22  ;;  %v800_v3 = vsel %vm797_vm9, %v793_v46, 0.0 }
0x12d1   :  { %804 = vrot.lane.b32.xlu1 %v798_v47, %s1307_s1 }
0x1343   :  { %v805_v49 = vpop.permute.xlu1 %804 }
0x1344   :  { %1116 = vmatmul.mubr.msk.f32.vlgmr.msra.gmra.mrb[6].mxu1 %vm26_vm3, %v805_v49 }
0x1417   :  { %v874_v53 = vpop.f32.mrb[6].mxu1 }
0x1418   :  { %v878_v54 = vadd.f32 %v987_v52, %v874_v53  ;;  %v1117_v55 = vpop.f32.mrb[7].mxu1 }
0x141a   :  { %1246 = vtanh.f32 %v878_v54  ;;  %v989_v61 = vmul.f32 -1.442695, %v878_v54 }
0x141c   :  { %1248 = vpow2.f32 %v989_v61 }
0x1424   :  { %v1247_v56 = vpop.eup %1246 }
0x1425   :  { %888 = vrot.lane.b32.xlu0 %v1247_v56, %s1306_s29 }
0x1426   :  { %v1249_v62 = vpop.eup %1248 }
0x1427   :  { %v882_v63 = vadd.f32 1.0, %v1249_v62 }
0x1429   :  { %904 = vperm.xlu0 %1189, %v1388_v10   ;;  %1250 = vrcp.f32 %v882_v63 }
0x142d   :  { %911 = vrot.lane.b32.xlu0 %v582_v57, %s1307_s1 }
0x1431   :  { %465 = vrot.lane.b32.xlu0 %v349_v59, %s1315_s0 }
0x1433   :  { %v1251_v0 = vpop.eup %1250 }
0x1434   :  { %v886_v60 = vmul.f32 %v1251_v0, %v799_v58 }
0x1497   :  { %v889_v1 = vpop.permute.xlu0 %888 }
0x1498   :  { %v891_v10 = vmul.f32 %v1251_v0, %v889_v1 }
0x149a   :  { %893 = vrot.lane.b32.xlu1 %v891_v10, %s1307_s1 }
0x14a8   :  { %v905_v4 = vpop.permute.xlu0 %904 }
0x14a9   :  { %vm906_vm10 = vcmp.eq.s32.totalorder %v905_v4, 1 }
0x14ac   :  { %v912_v7 = vpop.permute.xlu0 %911 }
0x14b0   :  { %v466_v14 = vpop.permute.xlu0 %465 }
0x150c   :  { %v894_v2 = vpop.permute.xlu1 %893 }
0x150d   :  { %v896_v5 = vadd.f32 %v894_v2, %v886_v60 }
0x150f   :  { %1252 = vtanh.f32 %v896_v5  ;;  %v908_v6 = vsel %vm906_vm10, %v896_v5, %v799_v58 }
0x1519   :  { %v1253_v11 = vpop.eup %1252 }
0x151a   :  { %899 = vrot.lane.b32.xlu1 %v1253_v11, %s1306_s29 }
0x151e   :  { %461 = vrot.lane.b32.xlu1 %v240_v13, %s1306_s29 }
0x1522   :  { %915 = vrot.lane.b32.xlu1 %v691_v8, %s1306_s29 }
0x1526   :  { %919 = vrot.lane.b32.xlu1 %v800_v3, %s1315_s0 }
0x152a   :  { %932 = vrot.lane.b32.xlu1 %v908_v6, %s1315_s0 }
0x158c   :  { %v900_v9 = vpop.permute.xlu1 %899 }
0x158d   :  { %v902_v48 = vmul.f32 %v1251_v0, %v900_v9 }
0x158f   :  { %v907_v50 = vsel %vm906_vm10, %v902_v48, %v798_v47  ;;  %v909_v22 = vsel %vm906_vm10, %v902_v48, 0.0 }
0x1590   :  { %927 = vrot.lane.b32.xlu0 %v907_v50, %s1307_s1  ;;  %v462_v12 = vpop.permute.xlu1 %461 }
0x1591   :  { %v468_v15 = vsel %vm26_vm3, %v1399_v30, %v462_v12 }
0x1592   :  { %v470_v17 = vsel %vm469_vm11, %v468_v15, %v466_v14 }
0x1593   :  { %v472_v18 = vsel %vm471_vm12, %v470_v17, %v458_v16 }
0x1594   :  { %473 = vst [vmem:[%s1608_s3] sm:$0xff] %v472_v18  ;;  %v916_v19 = vpop.permute.xlu1 %915 }
0x1595   :  { %v922_v20 = vsel %vm26_vm3, %v912_v7, %v916_v19 }
0x1598   :  { %v920_v21 = vpop.permute.xlu1 %919 }
0x1599   :  { %v923_v30 = vsel %vm469_vm11, %v922_v20, %v920_v21 }
0x159a   :  { %v924_v23 = vsel %vm471_vm12, %v923_v30, %v909_v22 }
0x159b   :  { %925 = vst [vmem:[%s1608_s3 + $0x8] sm:$0xff] %v924_v23 }
0x159c   :  { %v933_v34 = vpop.permute.xlu1 %932 }
0x159d   :  { %935 = vst.msk [vmem:[#allocation4] sm:$0xff] %vm26_vm3, %v933_v34 }
0x159e   :  { %1265 = shalt.err (!%p1262_p4)
}
0x159f   :  { %s1266_s27 = scalar_lea.hbm %s1610_s5, 128 }
0x15a0   :  { %p1267_p5 = scmp.ne.s32.totalorder %s1610_s5, %s1266_s27  ;;  %p1270_p6 = scmp.lt.u32.totalorder %s1266_s27, %s1610_s5 }
0x15a2   :  { %p1272_p7 = pnand %p1270_p6, %p1267_p5 }
0x15a4   :  { %1275 = shalt.err (!%p1272_p7)
}
0x15a5   :  { %957 = dma.vmem_to_hbm [thread:$0]  %s955_s22, 128, %s1610_s5, [#allocation5]  }
0x15a6   :  { %s1317_s7 = smov [#allocation2]  }
0x15a7   :  { %s944_s8 = sshll.u32 %s1317_s7, 4  ;;  %s945_s8 = int_to_ptr.vmem [resolvable:$true] %s944_s8 }
0x15a8   :  { %s1276_s9 = scalar_lea.vmem %s945_s8, 128  ;;  %p1281_p9 = scmp.lt.s32.totalorder %s945_s8, %s945_s8 }
0x15a9   :  { %p1277_p8 = scmp.ne.s32.totalorder %s945_s8, %s1276_s9  ;;  %p1282_p10 = scmp.lt.s32.totalorder %s1276_s9, %s1276_s9 }
0x15ab   :  { %p1283_p11 = por %p1282_p10, %p1281_p9 }
0x15ad   :  { %p1284_p12 = pnand %p1283_p11, %p1277_p8 }
0x1602   :  { %v928_v36 = vpop.permute.xlu0 %927 }
0x1603   :  { %930 = vst.msk [vmem:[#allocation2] sm:$0xff] %vm26_vm3, %v928_v36 }
0x1604   :  { %1287 = shalt.err (!%p1284_p12)
}
0x1605   :  { %s1288_s12 = scalar_lea.hbm %s1609_s4, 128 }
0x1606   :  { %p1289_p13 = scmp.ne.s32.totalorder %s1609_s4, %s1288_s12  ;;  %p1292_p0 = scmp.lt.u32.totalorder %s1288_s12, %s1609_s4 }
0x1608   :  { %p1294_p1 = pnand %p1292_p0, %p1289_p13 }
0x160a   :  { %1297 = shalt.err (!%p1294_p1)
}
0x160b   :  { %947 = dma.vmem_to_hbm [thread:$0]  %s945_s8, 128, %s1609_s4, [#allocation3]  }
0x160c   :  { %1298 = dma.done.wait [#allocation3], 128  }
0x160d   :  { %1299 = vsyncadd [#allocation3], 4294967168 }
0x160e   :  { %1300 = dma.done.wait [#allocation5], 128  }
0x160f   :  { %1301 = vsyncadd [#allocation5], 4294967168 }
0x1610   :  { %966 = vsyncpa [#allocation3], 1 }
0x1611   :  { %967 = vsyncpa [#allocation5], 1 }

</bundles_post_ra>
